<compile_context>
chip_gen: v5e
topology: v5e:2x2
jax: 0.10.0
libtpu: 0.0.40
codegen_flags: <defaults>
</compile_context>

<pallas_src>
import functools
import math

import jax
import jax.numpy as jnp
from jax.experimental import pallas as pl
from jax.experimental.pallas import tpu as pltpu


def _centerness_loss_kernel(pred_ref, target_ref, out_ref, *,
                            apply_sigmoid: bool, thresh: float):
    # Upcast to f32 for the transcendental math; downcast only on store.
    x = pred_ref[...].astype(jnp.float32)
    t = target_ref[...].astype(jnp.float32)

    lo = jnp.float32(thresh)
    hi = jnp.float32(1.0 - thresh)
    t = jnp.clip(t, lo, hi)

    if apply_sigmoid:
        # clamp(sigmoid(x), t, 1-t) == sigmoid(clamp(x, logit(t), logit(1-t)))
        # and BCE(sigmoid(x), t) = softplus(x) - t*x.
        x_lo = jnp.float32(math.log(thresh) - math.log(1.0 - thresh))
        x_hi = jnp.float32(math.log(1.0 - thresh) - math.log(thresh))
        x = jnp.clip(x, x_lo, x_hi)
        softplus = jnp.maximum(x, 0.0) + jnp.log1p(jnp.exp(-jnp.abs(x)))
        loss = softplus - t * x
    else:
        p = jnp.clip(x, lo, hi)
        # Clamp bounds the logs, so PyTorch's internal -100 floor never fires.
        loss = -(t * jnp.log(p) + (1.0 - t) * jnp.log1p(-p))

    out_ref[...] = loss.astype(out_ref.dtype)


def _round_up(x, m):
    return ((x + m - 1) // m) * m


def _flat_2d_view(shape):
    """Zero-copy 2-D (rows, lane) factorization of the element count."""
    total = 1
    for d in shape:
        total *= int(d)
    for lw in (1024, 512, 256, 128):
        if total % lw == 0:
            return total // lw, lw
    # No multiple-of-128 divisor (e.g. FCOS maps like 100x152): keep the
    # trailing dim on the lane axis; full-extent last block dim is always
    # legal and the partial lane tile is a masked store (HBM traffic unchanged).
    w = int(shape[-1])
    return total // w, w


def _block_budget():
    """(target block bytes, vmem_limit_bytes) chosen per TPU generation."""
    try:
        cap = pltpu.get_tpu_info().vmem_capacity_bytes
    except Exception:
        cap = None
    if cap is not None and cap >= 100 * 1024 * 1024:      # v5e / v6e: 128 MiB
        return 8 * 1024 * 1024, 64 * 1024 * 1024
    return 4 * 1024 * 1024, 32 * 1024 * 1024              # v7x (64 MiB) / unknown


def centerness_loss(pred, target, *, apply_sigmoid=True, threshold=1e-4,
                    out_dtype=None):
    """Elementwise centerness BCE loss; output has the same shape as pred."""
    assert pred.shape == target.shape, "pred/target shape mismatch"
    orig_shape = pred.shape
    out_dtype = pred.dtype if out_dtype is None else out_dtype

    rows, lane_w = _flat_2d_view(orig_shape)
    total = rows * lane_w
    itemsize = jnp.dtype(pred.dtype).itemsize

    # Zero-copy reshapes of contiguous arrays; reshape back below is zero-copy
    # too (same element count -> no pad, no slice).
    p2d = pred.reshape(rows, lane_w)
    t2d = target.reshape(rows, lane_w)

    block_target, vmem_limit = _block_budget()
    if rows < 16:
        tm = rows                                   # single full-extent block
    else:
        tm_cap = max(8, (block_target // (lane_w * itemsize)) // 8 * 8)
        tm_split = _round_up(pl.cdiv(rows, 2), 8)   # >= 2 steps -> both v7x TCs
        tm = max(8, min(tm_cap, tm_split))
    grid = (pl.cdiv(rows, tm),)
    block_bytes = tm * lane_w * itemsize
    vmem_limit = int(max(vmem_limit, 6 * block_bytes + (2 << 20)))

    kernel = functools.partial(
        _centerness_loss_kernel,
        apply_sigmoid=apply_sigmoid,
        thresh=float(threshold),
    )

    cost = pl.CostEstimate(
        flops=10 * total,
        transcendentals=2 * total,
        bytes_accessed=2 * total * itemsize
        + total * jnp.dtype(out_dtype).itemsize,
    )

    out2d = pl.pallas_call(
        kernel,
        out_shape=jax.ShapeDtypeStruct((rows, lane_w), out_dtype),
        grid_spec=pltpu.PrefetchScalarGridSpec(
            num_scalar_prefetch=0,
            grid=grid,
            in_specs=[
                pl.BlockSpec((tm, lane_w), lambda i: (i, 0)),
                pl.BlockSpec((tm, lane_w), lambda i: (i, 0)),
            ],
            out_specs=pl.BlockSpec((tm, lane_w), lambda i: (i, 0)),
        ),
        compiler_params=pltpu.CompilerParams(
            dimension_semantics=("parallel",),      # shards grid across v7x TCs
            vmem_limit_bytes=vmem_limit,
        ),
        cost_estimate=cost,
    )(p2d, t2d)

    return out2d.reshape(orig_shape)


def _reference(pred, target, apply_sigmoid=True, threshold=1e-4):
    p = jax.nn.sigmoid(pred) if apply_sigmoid else pred
    p = jnp.clip(p, threshold, 1.0 - threshold)
    t = jnp.clip(target, threshold, 1.0 - threshold)
    return -(t * jnp.log(p) + (1.0 - t) * jnp.log(1.0 - p))


def _check(shape, key, apply_sigmoid, atol=1e-5, rtol=1e-5):
    kp, kt = jax.random.split(key)
    if apply_sigmoid:
        pred = jax.random.normal(kp, shape, dtype=jnp.float32)       # logits
    else:
        pred = jax.random.uniform(kp, shape, dtype=jnp.float32)      # probs
    target = jax.random.uniform(kt, shape, dtype=jnp.float32)        # in [0,1)

    out = centerness_loss(pred, target, apply_sigmoid=apply_sigmoid,
                          threshold=1e-4)
    out = jax.block_until_ready(out)
    ref = _reference(pred, target, apply_sigmoid=apply_sigmoid, threshold=1e-4)
    assert out.shape == shape
    assert jnp.allclose(out, ref, atol=atol, rtol=rtol), (
        f"mismatch for shape={shape}, apply_sigmoid={apply_sigmoid}")


if __name__ == "__main__":
    key = jax.random.PRNGKey(0)
    k0, k1, k2, k3 = jax.random.split(key, 4)

    # Primary NCHW shape (conv-style inputs of the PyTorch module).
    _check((2, 4, 16, 16), k0, apply_sigmoid=True)

    # No-sigmoid path (inputs already probabilities).
    _check((2, 4, 16, 16), k1, apply_sigmoid=False)

    # Element count not a multiple of 128 -> (rows, W) path, ragged final
    # row-block handled by masking (no pad / slice).
    _check((2, 3, 15, 17), k2, apply_sigmoid=True)

    # FCOS-like feature map (W=152): odd lane width, 2 grid steps, masked tail.
    _check((2, 1, 100, 152), k3, apply_sigmoid=True)

    print("KERNEL_OK")
</pallas_src>

<mosaic_0001>
module attributes {stable_mosaic.version = 11 : i64} {
  func.func @_centerness_loss_kernel(%arg0: i32, %arg1: memref<2x1024xf32, #tpu.memory_space<vmem>>, %arg2: memref<2x1024xf32, #tpu.memory_space<vmem>>, %arg3: memref<2x1024xf32, #tpu.memory_space<vmem>>) attributes {dimension_semantics = [#tpu.dimension_semantics<parallel>], iteration_bounds = array<i64: 1>, scalar_prefetch = 0 : i64, scratch_operands = 0 : i64, tpu.core_type = #tpu.core_type<tc>, window_params = [{transform_indices = @transform_0, window_bounds = array<i64: 2, 1024>}, {transform_indices = @transform_1, window_bounds = array<i64: 2, 1024>}, {transform_indices = @transform_2, window_bounds = array<i64: 2, 1024>}]} {
    %c0 = arith.constant 0 : index
    %c0_0 = arith.constant 0 : index
    %0 = vector.load %arg1[%c0, %c0_0] : memref<2x1024xf32, #tpu.memory_space<vmem>>, vector<2x1024xf32>
    %c0_1 = arith.constant 0 : index
    %c0_2 = arith.constant 0 : index
    %1 = vector.load %arg2[%c0_1, %c0_2] : memref<2x1024xf32, #tpu.memory_space<vmem>>, vector<2x1024xf32>
    %cst = arith.constant 9.99999974E-5 : f32
    %cst_3 = arith.constant 0.999899983 : f32
    %2 = vector.broadcast %cst : f32 to vector<2x1024xf32>
    %3 = arith.maximumf %2, %1 : vector<2x1024xf32>
    %4 = vector.broadcast %cst_3 : f32 to vector<2x1024xf32>
    %5 = arith.minimumf %4, %3 : vector<2x1024xf32>
    %cst_4 = arith.constant -9.210240e+00 : f32
    %cst_5 = arith.constant 9.210240e+00 : f32
    %6 = vector.broadcast %cst_4 : f32 to vector<2x1024xf32>
    %7 = arith.maximumf %6, %0 : vector<2x1024xf32>
    %8 = vector.broadcast %cst_5 : f32 to vector<2x1024xf32>
    %9 = arith.minimumf %8, %7 : vector<2x1024xf32>
    %cst_6 = arith.constant 0.000000e+00 : f32
    %10 = vector.broadcast %cst_6 : f32 to vector<2x1024xf32>
    %11 = arith.maximumf %9, %10 : vector<2x1024xf32>
    %12 = math.absf %9 : vector<2x1024xf32>
    %cst_7 = arith.constant 0.000000e+00 : f32
    %13 = vector.broadcast %cst_7 : f32 to vector<2x1024xf32>
    %14 = arith.subf %13, %12 : vector<2x1024xf32>
    %15 = math.exp %14 : vector<2x1024xf32>
    %16 = math.log1p %15 : vector<2x1024xf32>
    %17 = arith.addf %11, %16 : vector<2x1024xf32>
    %18 = arith.mulf %5, %9 : vector<2x1024xf32>
    %19 = arith.subf %17, %18 : vector<2x1024xf32>
    %c0_8 = arith.constant 0 : index
    %c0_9 = arith.constant 0 : index
    %20 = vector.load %arg3[%c0_8, %c0_9] : memref<2x1024xf32, #tpu.memory_space<vmem>>, vector<2x1024xf32>
    tpu.vector_store %arg3[%c0_8, %c0_9], %19 {strides = array<i32>} : memref<2x1024xf32, #tpu.memory_space<vmem>>, vector<2x1024xf32>,
    return
  }
  func.func @transform_0(%arg0: i32) -> (i32, i32) {
    %c0_i32 = arith.constant 0 : i32
    %c0_i32_0 = arith.constant 0 : i32
    return %arg0, %c0_i32 : i32, i32
  }
  func.func @transform_1(%arg0: i32) -> (i32, i32) {
    %c0_i32 = arith.constant 0 : i32
    %c0_i32_0 = arith.constant 0 : i32
    return %arg0, %c0_i32 : i32, i32
  }
  func.func @transform_2(%arg0: i32) -> (i32, i32) {
    %c0_i32 = arith.constant 0 : i32
    %c0_i32_0 = arith.constant 0 : i32
    return %arg0, %c0_i32 : i32, i32
  }
}

</mosaic_0001>

<bundles_post_ra>
// kernel: tpu_custom_call.1
= control target key start
LH: loop header
LB: loop body
LE: loop exit
PB: predicated region body
PF: predicated region fallthrough
CT: control target
= control target key end

     0   :  { %7 = vsyncpa [#allocation3], 0  ;;  %s224_s0 = inlined_call_operand.hbm [shape: f32[2,1024], index: 0, kind: input, shape index: {}]   ;;  %s225_s1 = inlined_call_operand.hbm [shape: f32[2,1024], index: 1, kind: input, shape index: {}]   ;;  %s226_s2 = inlined_call_operand.hbm [shape: f32[2,1024], index: 2, kind: output, shape index: {}]  }
   0x1   :  { %8 = vsyncpa [#allocation6], 0 }
   0x2   :  { %9 = vsyncpa [#allocation4], 0  ;;  %s15_s11 = sshll.u32 %s224_s0, 4  ;;  %s197_s12 = smov [#allocation2]   ;;  %s16_s11 = int_to_ptr.hbm [resolvable:$true] %s15_s11 }
   0x3   :  { %s17_s13 = sshll.u32 %s197_s12, 4  ;;  %s26_s16 = sshll.u32 %s225_s1, 4  ;;  %s18_s13 = int_to_ptr.vmem [resolvable:$true] %s17_s13  ;;  %s27_s16 = int_to_ptr.hbm [resolvable:$true] %s26_s16 }
   0x4   :  { %20 = dma.hbm_to_vmem [thread:$0]  %s16_s11, 256, %s18_s13, [#allocation3]  }
   0x5   :  { %s198_s17 = smov [#allocation5]  }
   0x6   :  { %s28_s18 = sshll.u32 %s198_s17, 4  ;;  %s29_s18 = int_to_ptr.vmem [resolvable:$true] %s28_s18 }
   0x7   :  { %31 = dma.hbm_to_vmem [thread:$0]  %s27_s16, 256, %s29_s18, [#allocation6]  }
   0x8   :  { %191 = dma.done.wait [#allocation3], 256  }
   0x9   :  { %192 = vsyncadd [#allocation3], 4294967040 }
   0xa   :  { %193 = dma.done.wait [#allocation6], 256  }
   0xb   :  { %194 = vsyncadd [#allocation6], 4294967040  ;;  %v40_v0 = vld [vmem:[#allocation2] sm:$0xff]  ;;  %v41_v1 = vld [vmem:[#allocation2 + $0x8] sm:$0xff]  ;;  %s199_s0 = smov [#allocation7]   ;;  %s95_s21 = sshll.u32 %s226_s2, 4  ;;  %s96_s21 = int_to_ptr.hbm [resolvable:$true] %s95_s21 }
   0xc   :  { %v106_v2 = vclamps-f32 %v40_v0, 9.21024  ;;  %v107_v3 = vclamps-f32 %v41_v1, 9.21024  ;;  %v42_v11 = vld [vmem:[#allocation5] sm:$0xff]  ;;  %v43_v15 = vld [vmem:[#allocation5 + $0x8] sm:$0xff] }
   0xd   :  { %v44_v18 = vmax.f32 %v42_v11, 0.0001  ;;  %v45_v20 = vmax.f32 %v43_v15, 0.0001  ;;  %s93_s1 = sshll.u32 %s199_s0, 4  ;;  %s94_s1 = int_to_ptr.vmem [resolvable:$true] %s93_s1 }
   0xe   :  { %v54_v4 = vand.u32 2147483647, %v106_v2  ;;  %v55_v5 = vand.u32 2147483647, %v107_v3  ;;  %v52_v28 = vmax.f32 %v106_v2, 0.0  ;;  %v53_v32 = vmax.f32 %v107_v3, 0.0 }
   0xf   :  { %v46_v24 = vmin.f32 %v44_v18, 0.9999  ;;  %v47_v26 = vmin.f32 %v45_v20, 0.9999 }
  0x10   :  { %v56_v6 = vsub.f32 0.0, %v54_v4  ;;  %v57_v7 = vsub.f32 0.0, %v55_v5 }
  0x11   :  { %v82_v33 = vmul.f32 %v106_v2, %v46_v24  ;;  %v83_v36 = vmul.f32 %v107_v3, %v47_v26 }
  0x12   :  { %v58_v8 = vmul.f32 1.442695, %v56_v6  ;;  %v60_v9 = vmul.f32 1.442695, %v57_v7 }
  0x14   :  { %111 = vpow2.f32 %v58_v8 }
  0x15   :  { %113 = vpow2.f32 %v60_v9 }
  0x1a   :  { %v112_v10 = vpop.eup %111 }
  0x1b   :  { %v114_v12 = vpop.eup %113  ;;  %v62_v13 = vadd.f32 1.0, %v112_v10  ;;  %v65_v14 = vmul.f32 -0.5, %v112_v10  ;;  %v68_v21 = vand.u32 2147483647, %v112_v10 }
  0x1c   :  { %v71_v16 = vadd.f32 1.0, %v114_v12  ;;  %v74_v17 = vmul.f32 -0.5, %v114_v12  ;;  %v77_v23 = vand.u32 2147483647, %v114_v12 }
  0x1d   :  { %115 = vlog2.f32 %v62_v13  ;;  %v66_v19 = vadd.f32 1.0, %v65_v14  ;;  %vm69_vm0 = vcmp.lt.f32.partialorder %v68_v21, 0.0004427343 }
  0x1e   :  { %117 = vlog2.f32 %v71_v16  ;;  %v75_v22 = vadd.f32 1.0, %v74_v17  ;;  %vm78_vm1 = vcmp.lt.f32.partialorder %v77_v23, 0.0004427343 }
  0x1f   :  { %v67_v25 = vmul.f32 %v112_v10, %v66_v19 }
  0x20   :  { %v76_v29 = vmul.f32 %v114_v12, %v75_v22 }
  0x23   :  { %v116_v27 = vpop.eup %115 }
  0x24   :  { %v118_v30 = vpop.eup %117  ;;  %v64_v31 = vmul.f32 0.6931472, %v116_v27 }
  0x25   :  { %v73_v34 = vmul.f32 0.6931472, %v118_v30 }
  0x26   :  { %v70_v35 = vsel %vm69_vm0, %v67_v25, %v64_v31 }
  0x27   :  { %v80_v37 = vadd.f32 %v70_v35, %v52_v28  ;;  %v79_v38 = vsel %vm78_vm1, %v76_v29, %v73_v34 }
  0x28   :  { %v81_v39 = vadd.f32 %v79_v38, %v53_v32 }
  0x29   :  { %v84_v40 = vsub.f32 %v80_v37, %v82_v33 }
  0x2a   :  { %v85_v41 = vsub.f32 %v81_v39, %v83_v36 }
  0x2b   :  { %86 = vst [vmem:[#allocation7] sm:$0xff] %v84_v40 }
  0x2c   :  { %87 = vst [vmem:[#allocation7 + $0x8] sm:$0xff] %v85_v41 }
  0x2d   :  { %98 = dma.vmem_to_hbm [thread:$0]  %s94_s1, 256, %s96_s21, [#allocation4]  }
  0x2e   :  { %195 = dma.done.wait [#allocation4], 256  }
  0x2f   :  { %196 = vsyncadd [#allocation4], 4294967040 }
  0x30   :  { %103 = vsyncpa [#allocation3], 1 }
  0x31   :  { %104 = vsyncpa [#allocation6], 1 }
  0x32   :  { %105 = vsyncpa [#allocation4], 1 }

</bundles_post_ra>
